<compile_context>
chip_gen: v7x
topology: tpu7x:2x2x1
jax: 0.10.0
libtpu: 0.0.40
codegen_flags: <defaults>
</compile_context>

<pallas_src>
import math

import jax
import jax.numpy as jnp
from jax.experimental import pallas as pl
from jax.experimental.pallas import tpu as pltpu


def graph_conv_kernel(feat_k_ref, feat_i_ref, adj_ref, w_ref, w_self_ref,
                      inv_norm_ref, bias_ref, out_ref, acc_ref):
    """One (batch b, row-tile i, k-tile) step of the fused GraphConv forward.

    feat_k_ref   : (1, tk, Din)  bf16  node features, current k-tile
    feat_i_ref   : (1, tm, Din)  bf16  node features, current row-tile
    adj_ref      : (tm, tk)      bf16  adjacency tile (0/1 values, lossless)
    w_ref        : (Din, Dout)   bf16  linear.weight.T
    w_self_ref   : (Din, Dout)   bf16  linear_self.weight.T
    inv_norm_ref : (tm, 1)       f32   1 / rowsum(adj), current row-tile
    bias_ref     : (1, Dout)     f32   bias + bias_self (fused epilogue add)
    out_ref      : (1, tm, Dout) f32
    acc_ref      : (tm, Dout)    f32   VMEM accumulator over the k axis
    """
    k = pl.program_id(2)

    @pl.when(k == 0)
    def _():
        acc_ref[...] = jnp.zeros_like(acc_ref)

    # Neighbor branch for this k-tile: adj[i_tile, k_tile] @ (feat[b, k_tile] @ W).
    hw_k = jnp.dot(feat_k_ref[0], w_ref[...],
                   preferred_element_type=jnp.float32)            # (tk, Dout) f32
    acc_ref[...] += jnp.dot(adj_ref[...], hw_k.astype(jnp.bfloat16),
                            preferred_element_type=jnp.float32)   # (tm, Dout) f32

    @pl.when(k == pl.num_programs(2) - 1)
    def _():
        # Self branch + degree normalization + fused bias, written once.
        self_out = jnp.dot(feat_i_ref[0], w_self_ref[...],
                           preferred_element_type=jnp.float32)    # (tm, Dout) f32
        out_ref[0] = (acc_ref[...] * inv_norm_ref[...]
                      + self_out + bias_ref[...]).astype(out_ref.dtype)


def _pick_tile(n):
    """Largest 'nice' tile dividing n (full extent if none divides)."""
    for t in (512, 256, 128):
        if n >= t and n % t == 0:
            return t
    return n


def graph_conv(node_feat, adj, w, b, w_self, b_self):
    """GraphConv forward (normalize_adj=True, self_layer=True, bias=True).

    node_feat: (B, N, Din) f32, adj: (N, N) dense f32 (0/1 values),
    w/w_self: (Din, Dout) (already transposed so the kernel computes h @ W),
    b/b_self: (Dout,).  Returns (B, N, Dout) f32.
    """
    B, N, Din = node_feat.shape
    Dout = w.shape[1]
    tm = tk = _pick_tile(N)
    grid = (B, N // tm, N // tk)

    # Wrapper-side prep (done once, outside the hot kernel):
    #  * inv_norm in exact f32 from the 0/1 adjacency (no zero-degree guard,
    #    matching the PyTorch module),
    #  * operands cast to bf16 for the MXU,
    #  * both biases folded into one epilogue add.
    norm = jnp.sum(adj, axis=1, keepdims=True)                    # (N, 1)
    inv_norm = (1.0 / norm).astype(jnp.float32)
    bias_fused = (b + b_self).astype(jnp.float32).reshape(1, Dout)

    feat_bf = node_feat.astype(jnp.bfloat16)
    adj_bf = adj.astype(jnp.bfloat16)
    w_bf = w.astype(jnp.bfloat16)
    w_self_bf = w_self.astype(jnp.bfloat16)

    flops = (2 * B * (N // tm) * N * Din * Dout      # W branch (per row-tile)
             + 2 * B * N * Din * Dout                # self branch
             + 2 * B * N * N * Dout                  # aggregation
             + 3 * B * N * Dout)                     # epilogue
    bytes_accessed = (2 * (2 * B * N * Din + N * N + 2 * Din * Dout)
                      + 4 * (N + Dout + B * N * Dout))

    # Explicit VMEM budget from the actual tile sizes (4x headroom, >=16 MiB),
    # capped at 64 MiB so it is valid on v7x as well as v5e/v6e.
    per_step = (tk * Din * 2 + tm * Din * 2 + tm * tk * 2
                + 2 * Din * Dout * 2 + tm * 4 + Dout * 4 + tm * Dout * 4)
    vmem_limit = int(min(64 * 1024 * 1024,
                         max(16 * 1024 * 1024,
                             4 * (2 * per_step + tm * Dout * 4))))

    out = pl.pallas_call(
        graph_conv_kernel,
        out_shape=jax.ShapeDtypeStruct((B, N, Dout), jnp.float32),
        grid_spec=pltpu.PrefetchScalarGridSpec(
            num_scalar_prefetch=0,
            grid=grid,
            in_specs=[
                pl.BlockSpec((1, tk, Din), lambda bb, i, kk: (bb, kk, 0)),  # feat k-tile
                pl.BlockSpec((1, tm, Din), lambda bb, i, kk: (bb, i, 0)),   # feat row-tile
                pl.BlockSpec((tm, tk), lambda bb, i, kk: (i, kk)),          # adj tile
                pl.BlockSpec((Din, Dout), lambda bb, i, kk: (0, 0)),        # W
                pl.BlockSpec((Din, Dout), lambda bb, i, kk: (0, 0)),        # W_self
                pl.BlockSpec((tm, 1), lambda bb, i, kk: (i, 0)),            # inv_norm
                pl.BlockSpec((1, Dout), lambda bb, i, kk: (0, 0)),          # fused bias
            ],
            out_specs=pl.BlockSpec((1, tm, Dout), lambda bb, i, kk: (bb, i, 0)),
            scratch_shapes=[pltpu.VMEM((tm, Dout), jnp.float32)],
        ),
        compiler_params=pltpu.CompilerParams(
            dimension_semantics=("parallel", "parallel", "arbitrary"),
            vmem_limit_bytes=vmem_limit),
        cost_estimate=pl.CostEstimate(
            flops=flops, transcendentals=0, bytes_accessed=bytes_accessed),
    )(feat_bf, feat_bf, adj_bf, w_bf, w_self_bf, inv_norm, bias_fused)

    return out


def xavier_uniform(key, fan_in, fan_out):
    # Matches nn.init.xavier_uniform_ on a (out, in) weight, returned
    # transposed to (in, out) so the kernel computes h @ W directly.
    a = math.sqrt(6.0 / (fan_in + fan_out))
    return jax.random.uniform(key, (fan_in, fan_out), jnp.float32, -a, a)


if __name__ == "__main__":
    key = jax.random.PRNGKey(0)
    k_feat, k_adj, k_w, k_b, k_ws, k_bs = jax.random.split(key, 6)

    B, N, Din, Dout = 2, 16, 32, 32

    node_feat = jax.random.uniform(k_feat, (B, N, Din), jnp.float32)

    # Dense adjacency without self-loops; guarantee every node has >= 1
    # incoming edge so the degree normalization is well defined.
    adj = (jax.random.uniform(k_adj, (N, N)) > 0.6).astype(jnp.float32)
    adj = adj * (1.0 - jnp.eye(N, dtype=jnp.float32))          # remove self-loops
    ring = jnp.roll(jnp.eye(N, dtype=jnp.float32), 1, axis=1)  # degree >= 1
    adj = jnp.clip(adj + ring, 0.0, 1.0)

    # Deterministic parameter init mirroring GraphConv.initialize()
    w = xavier_uniform(k_w, Din, Dout)                                   # linear.weight.T
    b = jax.random.uniform(k_b, (Dout,), jnp.float32, -1.0, 1.0)         # linear.bias
    w_self = xavier_uniform(k_ws, Din, Dout)                             # linear_self.weight.T
    b_self = jax.random.uniform(k_bs, (Dout,), jnp.float32, -1.0, 1.0)   # linear_self.bias

    out = graph_conv(node_feat, adj, w, b, w_self, b_self)
    out = jax.block_until_ready(out)

    # Pure-JAX f32 reference (kernel uses bf16 operands -> loosened tolerance).
    hw = jnp.einsum("bnd,do->bno", node_feat, w) + b
    norm = jnp.sum(adj, axis=1, keepdims=True)
    ref = jnp.einsum("mn,bno->bmo", adj, hw) / norm
    ref = ref + jnp.einsum("bnd,do->bno", node_feat, w_self) + b_self
    assert out.shape == ref.shape
    assert jnp.allclose(out, ref, rtol=3e-2, atol=3e-2), "mismatch vs reference"

    print("KERNEL_OK")
</pallas_src>

<mosaic_0001>
module attributes {stable_mosaic.version = 11 : i64} {
  func.func @graph_conv_kernel(%arg0: i32, %arg1: i32, %arg2: i32, %arg3: memref<1x16x32xbf16, #tpu.memory_space<vmem>>, %arg4: memref<1x16x32xbf16, #tpu.memory_space<vmem>>, %arg5: memref<16x16xbf16, #tpu.memory_space<vmem>>, %arg6: memref<32x32xbf16, #tpu.memory_space<vmem>>, %arg7: memref<32x32xbf16, #tpu.memory_space<vmem>>, %arg8: memref<16x1xf32, #tpu.memory_space<vmem>>, %arg9: memref<1x32xf32, #tpu.memory_space<vmem>>, %arg10: memref<1x16x32xf32, #tpu.memory_space<vmem>>, %arg11: memref<16x32xf32, #tpu.memory_space<vmem>>) attributes {dimension_semantics = [#tpu.dimension_semantics<parallel>, #tpu.dimension_semantics<parallel>, #tpu.dimension_semantics<arbitrary>], iteration_bounds = array<i64: 2, 1, 1>, scalar_prefetch = 0 : i64, scratch_operands = 1 : i64, tpu.core_type = #tpu.core_type<tc>, window_params = [{transform_indices = @transform_0, window_bounds = array<i64: 1, 16, 32>}, {transform_indices = @transform_1, window_bounds = array<i64: 1, 16, 32>}, {transform_indices = @transform_2, window_bounds = array<i64: 16, 16>}, {pipeline_mode = #tpu.pipeline_mode<synchronous>, transform_indices = @transform_3, window_bounds = array<i64: 32, 32>}, {pipeline_mode = #tpu.pipeline_mode<synchronous>, transform_indices = @transform_4, window_bounds = array<i64: 32, 32>}, {transform_indices = @transform_5, window_bounds = array<i64: 16, 1>}, {pipeline_mode = #tpu.pipeline_mode<synchronous>, transform_indices = @transform_6, window_bounds = array<i64: 1, 32>}, {transform_indices = @transform_7, window_bounds = array<i64: 1, 16, 32>}]} {
    %c0_i32 = arith.constant 0 : i32
    %0 = arith.cmpi eq, %arg2, %c0_i32 : i32
    %1 = arith.extui %0 : i1 to i32
    %c0_i32_0 = arith.constant 0 : i32
    %2 = arith.cmpi ne, %1, %c0_i32_0 : i32
    scf.if %2 {
      %cst_14 = arith.constant 0.000000e+00 : f32
      %16 = vector.broadcast %cst_14 : f32 to vector<16x32xf32>
      %c0_15 = arith.constant 0 : index
      %c0_16 = arith.constant 0 : index
      %17 = vector.load %arg11[%c0_15, %c0_16] : memref<16x32xf32, #tpu.memory_space<vmem>>, vector<16x32xf32>
      tpu.vector_store %arg11[%c0_15, %c0_16], %16 {strides = array<i32>} : memref<16x32xf32, #tpu.memory_space<vmem>>, vector<16x32xf32>,
    } else {
    }
    %c0 = arith.constant 0 : index
    %c0_1 = arith.constant 0 : index
    %c0_2 = arith.constant 0 : index
    %3 = vector.load %arg3[%c0, %c0_1, %c0_2] : memref<1x16x32xbf16, #tpu.memory_space<vmem>>, vector<1x16x32xbf16>
    %4 = vector.shape_cast %3 : vector<1x16x32xbf16> to vector<16x32xbf16>
    %c0_3 = arith.constant 0 : index
    %c0_4 = arith.constant 0 : index
    %5 = vector.load %arg6[%c0_3, %c0_4] : memref<32x32xbf16, #tpu.memory_space<vmem>>, vector<32x32xbf16>
    %cst = arith.constant dense<0.000000e+00> : vector<16x32xf32>
    %6 = tpu.matmul %4, %5, %cst {dimension_numbers = #tpu.dot_dimension_numbers<[1], [0], [0], [1], [0, 0, 1, 1], [], []>} : vector<16x32xbf16>, vector<32x32xbf16>, vector<16x32xf32> -> vector<16x32xf32>
    %c0_5 = arith.constant 0 : index
    %c0_6 = arith.constant 0 : index
    %7 = vector.load %arg11[%c0_5, %c0_6] : memref<16x32xf32, #tpu.memory_space<vmem>>, vector<16x32xf32>
    %c0_7 = arith.constant 0 : index
    %c0_8 = arith.constant 0 : index
    %8 = vector.load %arg5[%c0_7, %c0_8] : memref<16x16xbf16, #tpu.memory_space<vmem>>, vector<16x16xbf16>
    %9 = arith.truncf %6 : vector<16x32xf32> to vector<16x32xbf16>
    %cst_9 = arith.constant dense<0.000000e+00> : vector<16x32xf32>
    %10 = tpu.matmul %8, %9, %cst_9 {dimension_numbers = #tpu.dot_dimension_numbers<[1], [0], [0], [1], [0, 0, 1, 1], [], []>} : vector<16x16xbf16>, vector<16x32xbf16>, vector<16x32xf32> -> vector<16x32xf32>
    %11 = arith.addf %7, %10 : vector<16x32xf32>
    %c0_10 = arith.constant 0 : index
    %c0_11 = arith.constant 0 : index
    %12 = vector.load %arg11[%c0_10, %c0_11] : memref<16x32xf32, #tpu.memory_space<vmem>>, vector<16x32xf32>
    tpu.vector_store %arg11[%c0_10, %c0_11], %11 {strides = array<i32>} : memref<16x32xf32, #tpu.memory_space<vmem>>, vector<16x32xf32>,
    %c0_i32_12 = arith.constant 0 : i32
    %13 = arith.cmpi eq, %arg2, %c0_i32_12 : i32
    %14 = arith.extui %13 : i1 to i32
    %c0_i32_13 = arith.constant 0 : i32
    %15 = arith.cmpi ne, %14, %c0_i32_13 : i32
    scf.if %15 {
      %c0_14 = arith.constant 0 : index
      %c0_15 = arith.constant 0 : index
      %c0_16 = arith.constant 0 : index
      %16 = vector.load %arg4[%c0_14, %c0_15, %c0_16] : memref<1x16x32xbf16, #tpu.memory_space<vmem>>, vector<1x16x32xbf16>
      %17 = vector.shape_cast %16 : vector<1x16x32xbf16> to vector<16x32xbf16>
      %c0_17 = arith.constant 0 : index
      %c0_18 = arith.constant 0 : index
      %18 = vector.load %arg7[%c0_17, %c0_18] : memref<32x32xbf16, #tpu.memory_space<vmem>>, vector<32x32xbf16>
      %cst_19 = arith.constant dense<0.000000e+00> : vector<16x32xf32>
      %19 = tpu.matmul %17, %18, %cst_19 {dimension_numbers = #tpu.dot_dimension_numbers<[1], [0], [0], [1], [0, 0, 1, 1], [], []>} : vector<16x32xbf16>, vector<32x32xbf16>, vector<16x32xf32> -> vector<16x32xf32>
      %c0_20 = arith.constant 0 : index
      %c0_21 = arith.constant 0 : index
      %20 = vector.load %arg11[%c0_20, %c0_21] : memref<16x32xf32, #tpu.memory_space<vmem>>, vector<16x32xf32>
      %c0_22 = arith.constant 0 : index
      %c0_23 = arith.constant 0 : index
      %21 = vector.load %arg8[%c0_22, %c0_23] : memref<16x1xf32, #tpu.memory_space<vmem>>, vector<16x1xf32>
      %22 = vector.broadcast %21 : vector<16x1xf32> to vector<16x32xf32>
      %23 = arith.mulf %20, %22 : vector<16x32xf32>
      %24 = arith.addf %23, %19 : vector<16x32xf32>
      %c0_24 = arith.constant 0 : index
      %c0_25 = arith.constant 0 : index
      %25 = vector.load %arg9[%c0_24, %c0_25] : memref<1x32xf32, #tpu.memory_space<vmem>>, vector<1x32xf32>
      %26 = vector.broadcast %25 : vector<1x32xf32> to vector<16x32xf32>
      %27 = arith.addf %24, %26 : vector<16x32xf32>
      %c0_26 = arith.constant 0 : index
      %c0_27 = arith.constant 0 : index
      %c0_28 = arith.constant 0 : index
      %28 = vector.load %arg10[%c0_26, %c0_27, %c0_28] : memref<1x16x32xf32, #tpu.memory_space<vmem>>, vector<1x16x32xf32>
      %29 = vector.shape_cast %28 : vector<1x16x32xf32> to vector<16x32xf32>
      %30 = vector.shape_cast %27 : vector<16x32xf32> to vector<1x16x32xf32>
      tpu.vector_store %arg10[%c0_26, %c0_27, %c0_28], %30 {strides = array<i32>} : memref<1x16x32xf32, #tpu.memory_space<vmem>>, vector<1x16x32xf32>,
    } else {
    }
    return
  }
  func.func @transform_0(%arg0: i32, %arg1: i32, %arg2: i32) -> (i32, i32, i32) {
    %c0_i32 = arith.constant 0 : i32
    %c0_i32_0 = arith.constant 0 : i32
    return %arg0, %arg2, %c0_i32 : i32, i32, i32
  }
  func.func @transform_1(%arg0: i32, %arg1: i32, %arg2: i32) -> (i32, i32, i32) {
    %c0_i32 = arith.constant 0 : i32
    %c0_i32_0 = arith.constant 0 : i32
    return %arg0, %arg1, %c0_i32 : i32, i32, i32
  }
  func.func @transform_2(%arg0: i32, %arg1: i32, %arg2: i32) -> (i32, i32) {
    %c0_i32 = arith.constant 0 : i32
    return %arg1, %arg2 : i32, i32
  }
  func.func @transform_3(%arg0: i32, %arg1: i32, %arg2: i32) -> (i32, i32) {
    %c0_i32 = arith.constant 0 : i32
    %c0_i32_0 = arith.constant 0 : i32
    %c0_i32_1 = arith.constant 0 : i32
    return %c0_i32, %c0_i32_0 : i32, i32
  }
  func.func @transform_4(%arg0: i32, %arg1: i32, %arg2: i32) -> (i32, i32) {
    %c0_i32 = arith.constant 0 : i32
    %c0_i32_0 = arith.constant 0 : i32
    %c0_i32_1 = arith.constant 0 : i32
    return %c0_i32, %c0_i32_0 : i32, i32
  }
  func.func @transform_5(%arg0: i32, %arg1: i32, %arg2: i32) -> (i32, i32) {
    %c0_i32 = arith.constant 0 : i32
    %c0_i32_0 = arith.constant 0 : i32
    return %arg1, %c0_i32 : i32, i32
  }
  func.func @transform_6(%arg0: i32, %arg1: i32, %arg2: i32) -> (i32, i32) {
    %c0_i32 = arith.constant 0 : i32
    %c0_i32_0 = arith.constant 0 : i32
    %c0_i32_1 = arith.constant 0 : i32
    return %c0_i32, %c0_i32_0 : i32, i32
  }
  func.func @transform_7(%arg0: i32, %arg1: i32, %arg2: i32) -> (i32, i32, i32) {
    %c0_i32 = arith.constant 0 : i32
    %c0_i32_0 = arith.constant 0 : i32
    return %arg0, %arg1, %c0_i32 : i32, i32, i32
  }
}

</mosaic_0001>

<bundles_post_ra>
// kernel: tpu_custom_call.1
= control target key start
LH: loop header
LB: loop body
LE: loop exit
PB: predicated region body
PF: predicated region fallthrough
CT: control target
= control target key end

     0   :  { %12 = vsyncpa [#allocation4], 0  ;;  %s1507_s0 = inlined_call_operand.vmem [shape: bf16[2,16,32], index: 0, kind: input, shape index: {}]   ;;  %s1508_s1 = inlined_call_operand.hbm [shape: bf16[2,16,32], index: 1, kind: input, shape index: {}]   ;;  %s1509_s2 = inlined_call_operand.hbm [shape: bf16[16,16], index: 2, kind: input, shape index: {}]   ;;  %s1510_s3 = inlined_call_operand.hbm [shape: bf16[32,32], index: 3, kind: input, shape index: {}]   ;;  %s1511_s4 = inlined_call_operand.vmem [shape: bf16[32,32], index: 4, kind: input, shape index: {}]   ;;  %s1512_s5 = inlined_call_operand.vmem [shape: f32[16,1], index: 5, kind: input, shape index: {}]   ;;  %s1513_s6 = inlined_call_operand.vmem [shape: f32[1,32], index: 6, kind: input, shape index: {}]   ;;  %s1514_s7 = inlined_call_operand.hbm [shape: f32[2,16,32], index: 7, kind: output, shape index: {}]  }
   0x1   :  { %14 = vsyncpa [#allocation4 + $0x1], 0 }
   0x2   :  { %15 = vsyncpa [#allocation7], 0 }
   0x3   :  { %16 = vsyncpa [#allocation5], 0 }
   0x4   :  { %18 = vsyncpa [#allocation5 + $0x1], 0  ;;  %s1208_s24 = smov 0   ;;  %s1210_s25 = smov 0  }
   0x5   :  { %s1212_s26 = smov 0   ;;  %s1214_s27 = smov 0  }
   0x6   :  { %s1216_s28 = smov 0   ;;  %s1218_s29 = smov 0  }
   0x7 LB: > { %1522 = sst [smem:[#allocation13_spill]] %s1135_s24  ;;  %s819_s30 = sadd.s32 4294967295, %s1155_s29   ;;  %s1155_s29 = sphi %s1218_s29, %s24_s29   ;;  %s1151_s28 = sphi %s1216_s28, %s1544_s28   ;;  %s1147_s27 = sphi %s1214_s27, %s1543_s27   ;;  %s1143_s26 = sphi %s1212_s26, %s1542_s26   ;;  %s1139_s25 = sphi %s1210_s25, %s1541_s25   ;;  %s1135_s24 = sphi %s1208_s24, %s1540_s24  }
   0x8   : > { %s820_s8 = sadd.s32 4294967294, %s1155_s29   ;;  %p93_p0 = scmp.ne.s32.totalorder %s1139_s25, %s1135_s24 }
   0x9   : > { %p1242_p1 = scmp.eq.s32.totalorder %s819_s30, 0  ;;  %p1246_p2 = scmp.eq.s32.totalorder %s819_s30, 1 }
   0xa   : > { %p242_p3 = scmp.eq.s32.totalorder %s820_s8, 1  ;;  %p821_p5 = scmp.ge.s32.totalorder %s1155_s29, 1 }
   0xb   : > { %s1523_s9 = scalar_select %p1242_p1, 1, 0 }
   0xc   : > { %p1252_p4 = por %p1242_p1, %p93_p0  ;;  %p1257_p6 = por %p242_p3, %p93_p0 }
   0xd   : > { %p249_p7 = scmp.lt.s32.totalorder %s1155_s29, 3  ;;  %s1157_s14 = smov [#allocation6]  }
   0xe   : > { %s1525_s11 = scalar_select %p1252_p4, 1, 0 }
   0xf   : > { %s1526_s12 = scalar_select %p1257_p6, 1, 0 }
  0x10   : > { %p1262_p8 = pnand %p821_p5, %p249_p7  ;;  %s265_s15 = sshll.u32 %s1157_s14, 4  ;;  %s1266_s15 = int_to_ptr.vmem [resolvable:$true] %s265_s15 }
  0x11   : > { %1527 = sst [smem:[#allocation14_spill]] %s1526_s12  ;;  %s1158_s17 = smov [#allocation8]  }
  0x12   : > { %p897_p9 = pneg %p1262_p8  ;;  %s278_s18 = sshll.u32 %s1158_s17, 4  ;;  %s1277_s18 = int_to_ptr.vmem [resolvable:$true] %s278_s18 }
  0x13   : > { %s983_s21 = scalar_lea.hbm %s1509_s2, 128 }
  0x14   : > { %p1273_p11 = pnand %p897_p9, %p1242_p1  ;;  %p984_p12 = scmp.ne.s32.totalorder %s1509_s2, %s983_s21 }
  0x15   : > { %p990_p5 = scmp.lt.u32.totalorder %s983_s21, %s1509_s2 }
  0x16   : > { %p985_p13 = pneg %p1273_p11 }
  0x18   : > { %p986_p0 = pnand %p985_p13, %p984_p12 }
  0x1a   : > { %p987_p3 = pneg %p986_p0 }
  0x1c   : > { %p992_p7 = pnand %p990_p5, %p987_p3 }
  0x1e   : > { %995 = shalt.err (!%p992_p7)
}
  0x1f   : > { %s996_s14 = scalar_lea.vmem %s1266_s15, 128  ;;  %p1004_p1 = scmp.lt.s32.totalorder %s1266_s15, %s1266_s15 }
  0x20   : > { %p997_p9 = scmp.ne.s32.totalorder %s1266_s15, %s996_s14  ;;  %p1005_p12 = scmp.lt.s32.totalorder %s996_s14, %s996_s14 }
  0x22   : > { %p999_p10 = pnand %p997_p9, %p985_p13  ;;  %p1006_p0 = por %p1005_p12, %p1004_p1 }
  0x24   : > { %p1000_p6 = pneg %p999_p10 }
  0x26   : > { %p1007_p4 = pnand %p1006_p0, %p1000_p6 }
  0x28   : > { %1010 = shalt.err (!%p1007_p4)
}
  0x29   : > { %s1520_s17 = smov 64   ;;  %s1160_s19 = smov 4  }
  0x2a   : > { %900 = dma.hbm_to_vmem [thread:$0]  (!%p1273_p11), %s1509_s2, 128, %s1266_s15, [#allocation7], %s1520_s17, %s1520_s17, %s1160_s19  }
  0x2b   : > { %s1011_s30 = scalar_lea.hbm %s1510_s3, 256 }
  0x2c   : > { %p1012_p1 = scmp.ne.s32.totalorder %s1510_s3, %s1011_s30  ;;  %p1018_p10 = scmp.lt.u32.totalorder %s1011_s30, %s1510_s3 }
  0x2e   : > { %p1014_p4 = pnand %p1012_p1, %p985_p13 }
  0x30   : > { %p1015_p6 = pneg %p1014_p4 }
  0x32   : > { %p1020_p3 = pnand %p1018_p10, %p1015_p6 }
  0x34   : > { %1023 = shalt.err (!%p1020_p3)
}
  0x35   : > { %s1024_s15 = scalar_lea.vmem %s1277_s18, 256  ;;  %p1032_p12 = scmp.lt.s32.totalorder %s1277_s18, %s1277_s18 }
  0x36   : > { %p1025_p5 = scmp.ne.s32.totalorder %s1277_s18, %s1024_s15  ;;  %p1033_p0 = scmp.lt.s32.totalorder %s1024_s15, %s1024_s15 }
  0x38   : > { %p1027_p7 = pnand %p1025_p5, %p985_p13  ;;  %p1034_p1 = por %p1033_p0, %p1032_p12 }
  0x3a   : > { %p1028_p9 = pneg %p1027_p7 }
  0x3c   : > { %p1035_p4 = pnand %p1034_p1, %p1028_p9 }
  0x3e   : > { %1038 = shalt.err (!%p1035_p4)
}
  0x3f   : > { %903 = dma.hbm_to_vmem [thread:$0]  (!%p1273_p11), %s1510_s3, 256, %s1277_s18, [#allocation7], %s1520_s17, %s1520_s17, %s1160_s19  }
  0x40   : > { %s43_s16 = sadd.s32 1, %s1151_s28  ;;  %s80_s20 = sadd.s32 1, %s1143_s26 }
  0x41   : > { %p45_p13 = scmp.ge.s32.totalorder %s43_s16, 2  ;;  %p87_p6 = scmp.ne.s32.totalorder %s1143_s26, %s1139_s25 }
  0x42   : > { %p88_p10 = scmp.eq.s32.totalorder %s1155_s29, 0  ;;  %p914_p3 = scmp.lt.s32.totalorder %s1155_s29, 2 }
  0x43   : > { %s1546_s16 = smov (%p45_p13, %s43_s16), 0  ;;  %p1347_p7 = por %p1246_p2, %p87_p6 }
  0x44   : > { %p89_p5 = por %p88_p10, %p87_p6  ;;  %s75_s22 = ssub.s32 %s1151_s28, %s1546_s16 }
  0x45   : > { %s1530_s21 = scalar_select %p1347_p7, 1, 0 }
  0x46   : > { %s320_s23 = sand.u32 1, %s1143_s26   ;;  %p78_p9 = scmp.eq.s32.totalorder %s75_s22, 0 }
  0x47   : > { %s826_s18 = sshll.u32 %s320_s23, 3  ;;  %s852_s30 = sshll.u32 %s1151_s28, 7 }
  0x48   : > { %s1356_s8 = scalar_select %p78_p9, %s1143_s26, %s80_s20  }
  0x49   : > { %s1361_s24 = scalar_lea.hbm %s1508_s1, %s852_s30  ;;  %s324_s10 = scalar_lea.vmem [#allocation3], %s826_s18 }
  0x4a   : > { %s333_s12 = sshll.u32 %s324_s10, 4  ;;  %p1365_p2 = pnand %p914_p3, %p89_p5  ;;  %s1369_s12 = int_to_ptr.vmem [resolvable:$true] %s333_s12 }
  0x4b   : > { %s1371_s20 = scalar_lea.sflag [#allocation4], %s320_s23  ;;  %s1039_s22 = scalar_lea.hbm %s1361_s24, 128 }
  0x4c   : > { %p1040_p11 = scmp.ne.s32.totalorder %s1361_s24, %s1039_s22  ;;  %p1041_p12 = pneg %p1365_p2 }
  0x4d   : > { %s1044_s14 = scalar_lea.hbm %s1508_s1, 256  ;;  %p1045_p4 = scmp.lt.u32.totalorder %s1361_s24, %s1508_s1 }
  0x4e   : > { %p1042_p0 = pnand %p1041_p12, %p1040_p11  ;;  %p1046_p13 = scmp.lt.u32.totalorder %s1044_s14, %s1039_s22 }
  0x4f   : > { %p1048_p10 = scmp.lt.u32.totalorder %s1039_s22, %s1361_s24 }
  0x50   : > { %p1043_p1 = pneg %p1042_p0  ;;  %p1047_p6 = por %p1046_p13, %p1045_p4 }
  0x52   : > { %p1049_p3 = por %p1048_p10, %p1047_p6 }
  0x54   : > { %p1050_p5 = pnand %p1049_p3, %p1043_p1 }
  0x56   : > { %1053 = shalt.err (!%p1050_p5)
}
  0x57   : > { %s1054_s23 = scalar_lea.vmem %s1369_s12, 128  ;;  %s1161_s18 = smov [#allocation3]  }
  0x58   : > { %p1055_p9 = scmp.ne.s32.totalorder %s1369_s12, %s1054_s23  ;;  %s1059_s30 = sshll.u32 %s1161_s18, 4  ;;  %s1060_s30 = int_to_ptr.vmem [resolvable:$false] %s1059_s30 }
  0x59   : > { %s1061_s15 = scalar_lea.vmem %s1060_s30, 256  ;;  %p1062_p7 = scmp.lt.s32.totalorder %s1369_s12, %s1060_s30 }
  0x5a   : > { %p1057_p11 = pnand %p1055_p9, %p1041_p12  ;;  %p1063_p4 = scmp.lt.s32.totalorder %s1061_s15, %s1054_s23 }
  0x5c   : > { %p1058_p0 = pneg %p1057_p11  ;;  %p1064_p13 = por %p1063_p4, %p1062_p7 }
  0x5e   : > { %p1065_p6 = pnand %p1064_p13, %p1058_p0 }
  0x60   : > { %1068 = shalt.err (!%p1065_p6)
}
  0x61   : > { %s1532_s22 = smov 64   ;;  %345 = sbr.rel (%p1262_p8) target bundleno = 582 (0x246), region = 48 }
  0x62   : > { %907 = dma.hbm_to_vmem [thread:$0]  (!%p1365_p2), %s1361_s24, 128, %s1369_s12, %s1371_s20, %s1532_s22, %s1532_s22, %s1160_s19  }
  0x63   : > { %s1405_s14 = sand.u32 (!%p1262_p8), 1, %s1139_s25   ;;  %p1533_p7 = scmp.ne.s32.totalorder (!%p1262_p8), %s1525_s11, 0 }
  0x64   : > { %s830_s10 = sshll.u32 (!%p1262_p8), %s1405_s14, 3  ;;  %s348_s23 = scalar_lea.sflag (!%p1262_p8), [#allocation4], %s1405_s14 }
  0x65   : > { %s1409_s18 = scalar_lea.vmem (!%p1262_p8), [#allocation3], %s830_s10 }
  0x68   : > { %1122 = dma.done.wait (%p1533_p7), %s348_s23, 128  }
  0x69   : > { %1124 = vsyncadd (%p1533_p7), %s348_s23, 4294967168  ;;  %p1534_p2 = scmp.ne.s32.totalorder %s1523_s9, 0 }
  0x6b   : > { %1126 = dma.done.wait (%p1534_p2), [#allocation7], 384  }
  0x6c   : > { %1128 = vsyncadd (%p1534_p2), [#allocation7], 4294966912  ;;  %p405_p8 = scmp.lt.s32.totalorder %s1147_s27, 1  ;;  %vm428_vm0 = vcmask 261120   ;;  %v1162_v0 = vmov 0.0   ;;  %vm1163_vm1 = vmmov 0  }
  0x6d   : > { %863 = vmatprep.subr.bf16.mxu0 %v1162_v0  ;;  %867 = vmatprep.mubr.msk.bf16.mxu0 %vm1163_vm1, %v1162_v0  ;;  %429 = vst.msk [vmem:[#allocation2] sm:$0xff] %vm428_vm0, %v1162_v0  ;;  %430 = vst.msk [vmem:[#allocation2 + $0x8] sm:$0xff] %vm428_vm0, %v1162_v0  ;;  %v976_v1 = vld [vmem:[#allocation8] sm:$0xff]   ;;  %v977_v2 = vld [vmem:[#allocation8 + $0x8] sm:$0xff]   ;;  %v1164_v5 = vmov 0   ;;  %vm509_vm2 = vcmask 130048  }
  0x6e   : > { %s406_s11 = scalar_select %p405_p8, %s1147_s27, 1  ;;  %871 = vmatprep.subr.bf16.mxu1 %v1162_v0  ;;  %873 = vmatprep.mubr.msk.bf16.mxu1 %vm1163_vm1, %v1162_v0  ;;  %v630_v4 = vld [vmem:[%s1512_s5] sm:$0xff]  ;;  %v631_v6 = vld [vmem:[%s1512_s5 + $0x8] sm:$0xff]  ;;  %v982_v15 = vld [vmem:[%s1409_s18] sm:$0xff]  }
  0x6f   : > { %864 = vmatpush3.bf16.msra.mxu0 %v976_v1  ;;  %975 = vset.pattern.permute.xlu0 %v1164_v5  ;;  %v979_v12 = vld [vmem:[#allocation6] sm:$0xff]   ;;  %v981_v14 = vld [vmem:[%s1511_s4 + $0x8] sm:$0xff]   ;;  %s854_s9 = sshll.u32 %s1147_s27, 8  ;;  %s658_s27 = scalar_lea.sflag [#allocation5], %s1405_s14 }
  0x70   : > { %s853_s13 = sshll.u32 %s406_s11, 3  ;;  %865 = vmatprep.subr.bf16.mxu0 %v1162_v0  ;;  %634 = vperm.xlu0 %975, %v630_v4   ;;  %v980_v13 = vld [vmem:[%s1511_s4] sm:$0xff]   ;;  %s833_s11 = sshll.u32 %s1405_s14, 4 }
  0x71   : > { %s412_s19 = scalar_lea.vmem %s1507_s0, %s853_s13  ;;  %v846_v33 = vld [vmem:[%s1513_s6] ss:$0 sm:$0xff]  ;;  %s403_s17 = scalar_lea.vmem [#allocation9], %s833_s11 }
  0x72   : > { %v978_v3 = vld [vmem:[%s412_s19] sm:$0xff]   ;;  %s673_s19 = sshll.u32 %s403_s17, 4  ;;  %s1454_s20 = scalar_lea.hbm %s1514_s7, %s854_s9  ;;  %s1456_s19 = int_to_ptr.vmem [resolvable:$true] %s673_s19 }
  0x73   : > { %866 = vmatpush3.bf16.msra.mxu0 %v977_v2  ;;  %s1069_s30 = scalar_lea.vmem %s1456_s19, 256  ;;  %p1535_p1 = scmp.ne.s32.totalorder %s1530_s21, 0 }
  0x74   : > { %639 = vperm.xlu0 %975, %v631_v6   ;;  %v499_v16 = vld [vmem:[#allocation2] sm:$0xff]  ;;  %v500_v18 = vld [vmem:[#allocation2 + $0x8] sm:$0xff]  ;;  %p1070_p12 = scmp.ne.s32.totalorder %s1456_s19, %s1069_s30  ;;  %s1165_s15 = smov [#allocation9]  }
  0x75   : > { %s1073_s22 = sshll.u32 %s1165_s15, 4  ;;  %s1074_s22 = int_to_ptr.vmem [resolvable:$false] %s1073_s22 }
  0x76   : > { %868 = vmatmul.mubr.msk.bf16.vlgmr.msra.gmra.mrb[0].mxu0 %vm428_vm0, %v978_v3  ;;  %p1071_p10 = pnand %p1070_p12, %p1535_p1  ;;  %s1075_s10 = scalar_lea.vmem %s1074_s22, 512 }
  0x77   : > { %p1076_p5 = scmp.lt.s32.totalorder %s1456_s19, %s1074_s22  ;;  %p1077_p9 = scmp.lt.s32.totalorder %s1075_s10, %s1069_s30 }
  0x78   : > { %p1072_p3 = pneg %p1071_p10 }
  0x79   : > { %p1078_p11 = por %p1077_p9, %p1076_p5 }
  0x7b   : > { %p1079_p0 = pnand %p1078_p11, %p1072_p3 }
  0xef   : > { %v635_v24 = vpop.permute.xlu0 %634 }
  0xf3   : > { %v640_v31 = vpop.permute.xlu0 %639 }
 0x149   : > { %v492_v7 = vpop.f32.mrb[0].mxu0 }
 0x14a   : > { %v869_v8 = vpop.f32.mrb[1].mxu0 }
 0x14b   : > { %v495_v9 = vpop.f32.mrb[2].mxu0 }
 0x14c   : > { %v503_v10 = vpack.c.bf16 %v495_v9, %v492_v7  ;;  %v870_v11 = vpop.f32.mrb[3].mxu0 }
 0x14e   : > { %872 = vmatpush3.bf16.msra.mxu1 %v503_v10 }
 0x14f   : > { %877 = vmatprep.subr.bf16.mxu1 %v1162_v0 }
 0x151   : > { %874 = vmatmul.mubr.msk.bf16.vlgmr.msra.gmra.mrb[0].mxu1 %vm509_vm2, %v979_v12 }
 0x152   : > { %878 = vmatpush3.bf16.msra.mxu1 %v980_v13  ;;  %881 = vmatprep.mubr.msk.bf16.mxu1 %vm1163_vm1, %v1162_v0 }
 0x153   : > { %879 = vmatprep.subr.bf16.mxu1 %v1162_v0 }
 0x156   : > { %880 = vmatpush3.bf16.msra.mxu1 %v981_v14 }
 0x159   : > { %882 = vmatmul.mubr.msk.bf16.vlgmr.msra.gmra.mrb[4].mxu1 %vm428_vm0, %v982_v15 }
 0x224   : > { %v547_v17 = vpop.f32.mrb[0].mxu1 }
 0x225   : > { %v554_v19 = vadd.f32 %v547_v17, %v499_v16  ;;  %v875_v20 = vpop.f32.mrb[1].mxu1 }
 0x226   : > { %v550_v21 = vpop.f32.mrb[2].mxu1 }
 0x227   : > { %556 = vst.msk [vmem:[#allocation2] sm:$0xff] %vm428_vm0, %v554_v19  ;;  %v555_v22 = vadd.f32 %v550_v21, %v500_v18  ;;  %v876_v23 = vpop.f32.mrb[3].mxu1 }
 0x229   : > { %557 = vst.msk [vmem:[#allocation2 + $0x8] sm:$0xff] %vm428_vm0, %v555_v22 }
 0x22c   : > { %v621_v25 = vpop.f32.mrb[4].mxu1 }
 0x22d   : > { %v883_v26 = vpop.f32.mrb[5].mxu1 }
 0x22e   : > { %v628_v27 = vld [vmem:[#allocation2] sm:$0xff]  ;;  %v624_v28 = vpop.f32.mrb[6].mxu1 }
 0x22f   : > { %v642_v29 = vmul.f32 %v635_v24, %v628_v27  ;;  %v884_v30 = vpop.f32.mrb[7].mxu1 }
 0x230   : > { %v629_v32 = vld [vmem:[#allocation2 + $0x8] sm:$0xff] }
 0x231   : > { %v643_v34 = vmul.f32 %v640_v31, %v629_v32  ;;  %v644_v35 = vadd.f32 %v642_v29, %v621_v25 }
 0x233   : > { %v653_v36 = vadd.f32 %v846_v33, %v644_v35  ;;  %v645_v37 = vadd.f32 %v643_v34, %v624_v28 }
 0x235   : > { %655 = vst.msk [vmem:[%s403_s17] sm:$0xff] %vm428_vm0, %v653_v36  ;;  %v654_v38 = vadd.f32 %v846_v33, %v645_v37 }
 0x237   : > { %656 = vst.msk [vmem:[%s403_s17 + $0x8] sm:$0xff] %vm428_vm0, %v654_v38 }
 0x238   : > { %1082 = shalt.err (!%p1079_p0)
}
 0x239   : > { %s1083_s23 = scalar_lea.hbm %s1454_s20, 256  ;;  %s1087_s13 = scalar_lea.hbm %s1514_s7, 512 }
 0x23a   : > { %p1084_p4 = scmp.ne.s32.totalorder %s1454_s20, %s1083_s23  ;;  %p1088_p7 = scmp.lt.u32.totalorder %s1454_s20, %s1514_s7 }
 0x23b   : > { %p1089_p2 = scmp.lt.u32.totalorder %s1087_s13, %s1083_s23  ;;  %p1091_p12 = scmp.lt.u32.totalorder %s1083_s23, %s1454_s20 }
 0x23c   : > { %p1085_p13 = pnand %p1084_p4, %p1535_p1 }
 0x23d   : > { %p1090_p8 = por %p1089_p2, %p1088_p7 }
 0x23e   : > { %p1086_p6 = pneg %p1085_p13 }
 0x23f   : > { %p1092_p10 = por %p1091_p12, %p1090_p8 }
 0x241   : > { %p1093_p3 = pnand %p1092_p10, %p1086_p6 }
 0x243   : > { %1096 = shalt.err (!%p1093_p3)
}
 0x244   : > { %s1166_s24 = smov 128   ;;  %s1167_s12 = smov 8  }
 0x245   : > { %895 = dma.vmem_to_hbm [thread:$0]  (%p1535_p1), %s1456_s19, 256, %s1454_s20, %s658_s27, %s1166_s24, %s1166_s24, %s1167_s12  }
 0x246 PF: > { %s1536_s30 = sld [smem:[#allocation13_spill]]  ;;  %s1537_s15 = sld [smem:[#allocation14_spill]] }
 0x247   : > { %p1539_p9 = scmp.ge.s32.totalorder %s1155_s29, 2 }
 0x24c   : > { %s688_s22 = sand.u32 1, %s1536_s30   ;;  %p1538_p5 = scmp.ne.s32.totalorder %s1537_s15, 0 }
 0x24d   : > { %s689_s10 = scalar_lea.sflag [#allocation5], %s688_s22 }
 0x24e   : > { %p909_p11 = pnand %p1539_p9, %p1538_p5 }
 0x250   : > { %1130 = dma.done.wait (!%p909_p11), %s689_s10, 256  }
 0x251   : > { %1132 = vsyncadd (!%p909_p11), %s689_s10, 4294967040  ;;  %s24_s29 = sadd.s32 1, %s1155_s29   ;;  %s1540_s24 = smov %s1139_s25 }
 0x252   : > { %p21_p0 = scmp.ge.s32.totalorder %s24_s29, 4   ;;  %s1541_s25 = smov %s1143_s26 }
 0x253   : > { %s1542_s26 = smov %s1356_s8  ;;  %s1543_s27 = smov %s1151_s28 }
 0x254   : > { %s1544_s28 = smov %s1546_s16  ;;  %23 = sbr.rel (!%p21_p0) target bundleno = 7 (0x7), region = 116 }
 0x25b   :  { %694 = vsyncpa [#allocation4], 1 }
 0x25c   :  { %696 = vsyncpa [#allocation4 + $0x1], 1 }
 0x25d   :  { %697 = vsyncpa [#allocation7], 1 }
 0x25e   :  { %698 = vsyncpa [#allocation5], 1 }
 0x25f   :  { %700 = vsyncpa [#allocation5 + $0x1], 1 }

</bundles_post_ra>
